<compile_context>
chip_gen: v5e
topology: v5e:2x2
jax: 0.10.0
libtpu: 0.0.40
codegen_flags: <defaults>
</compile_context>

<pallas_src>
import jax
import jax.numpy as jnp
from jax.experimental import pallas as pl
from jax.experimental.pallas import tpu as pltpu

LANE = 128  # TPU lane width (used only for the packed-bias buffer)

IN_SIZE = 128
H1_SIZE = 128
H2_SIZE = 64
H3_SIZE = 32
OUT_SIZE = 1


def mlp_kernel(x_ref, w1_ref, w2_ref, w3_ref, w4_ref, b_ref, o_ref):
    """Fused forward pass for one batch tile: 4 MXU matmuls + f32 epilogues."""
    cdt = w1_ref.dtype                      # matmul-operand (compute) dtype
    b = b_ref[...]                          # (4, 128) f32, packed biases
    b1 = b[0:1, :H1_SIZE]
    b2 = b[1:2, :H2_SIZE]
    b3 = b[2:3, :H3_SIZE]
    b4 = b[3:4, :OUT_SIZE]

    h = jnp.dot(x_ref[...], w1_ref[...], preferred_element_type=jnp.float32)
    h = jnp.maximum(h + b1, 0.0)

    h = jnp.dot(h.astype(cdt), w2_ref[...], preferred_element_type=jnp.float32)
    h = jnp.maximum(h + b2, 0.0)

    h = jnp.dot(h.astype(cdt), w3_ref[...], preferred_element_type=jnp.float32)
    h = jnp.maximum(h + b3, 0.0)

    out = jnp.dot(h.astype(cdt), w4_ref[...], preferred_element_type=jnp.float32)
    o_ref[...] = (out + b4).astype(o_ref.dtype)


def prepare_params(params, compute_dtype=jnp.float32):
    """Real-shaped weights (cast to compute dtype) + one packed f32 bias buffer."""
    (w1, b1), (w2, b2), (w3, b3), (w4, b4) = params
    b_packed = jnp.zeros((4, LANE), jnp.float32)
    b_packed = b_packed.at[0, :H1_SIZE].set(b1)
    b_packed = b_packed.at[1, :H2_SIZE].set(b2)
    b_packed = b_packed.at[2, :H3_SIZE].set(b3)
    b_packed = b_packed.at[3, :OUT_SIZE].set(b4)
    return (w1.astype(compute_dtype), w2.astype(compute_dtype),
            w3.astype(compute_dtype), w4.astype(compute_dtype), b_packed)


def net_forward(x, prepared, *, block_b=128):
    """x: [B, 128]. Returns [B, 1] f32."""
    w1, w2, w3, w4, bp = prepared
    cdt = w1.dtype
    B = x.shape[0]

    # Batch tile: multiple of 8 sublanes, at most block_b rows.
    TB = max(8, min(block_b, ((B + 7) // 8) * 8))
    TB = ((TB + 7) // 8) * 8
    B_pad = ((B + TB - 1) // TB) * TB
    if B_pad != B:
        x = jnp.pad(x, ((0, B_pad - B), (0, 0)))
    x = x.astype(cdt)

    grid = (B_pad // TB,)
    out = pl.pallas_call(
        mlp_kernel,
        out_shape=jax.ShapeDtypeStruct((B_pad, OUT_SIZE), jnp.float32),
        grid_spec=pltpu.PrefetchScalarGridSpec(
            num_scalar_prefetch=0,
            grid=grid,
            in_specs=[
                pl.BlockSpec((TB, IN_SIZE), lambda i: (i, 0)),       # x tile
                pl.BlockSpec((IN_SIZE, H1_SIZE), lambda i: (0, 0)),  # W1 resident
                pl.BlockSpec((H1_SIZE, H2_SIZE), lambda i: (0, 0)),  # W2 resident
                pl.BlockSpec((H2_SIZE, H3_SIZE), lambda i: (0, 0)),  # W3 resident
                pl.BlockSpec((H3_SIZE, OUT_SIZE), lambda i: (0, 0)), # W4 resident
                pl.BlockSpec((4, LANE), lambda i: (0, 0)),           # packed biases
            ],
            out_specs=pl.BlockSpec((TB, OUT_SIZE), lambda i: (i, 0)),
        ),
        compiler_params=pltpu.CompilerParams(
            dimension_semantics=("parallel",)),
    )(x, w1, w2, w3, w4, bp)
    return out[:B]


def ref_forward(x, params):
    """Pure-JAX reference of PyTorch Net.forward."""
    (w1, b1), (w2, b2), (w3, b3), (w4, b4) = params
    h = jnp.maximum(x @ w1 + b1, 0.0)
    h = jnp.maximum(h @ w2 + b2, 0.0)
    h = jnp.maximum(h @ w3 + b3, 0.0)
    return h @ w4 + b4


def init_params(key):
    """PyTorch nn.Linear-style init: U(-1/sqrt(fan_in), 1/sqrt(fan_in))."""
    sizes = [(IN_SIZE, H1_SIZE), (H1_SIZE, H2_SIZE),
             (H2_SIZE, H3_SIZE), (H3_SIZE, OUT_SIZE)]
    params = []
    for (f_in, f_out) in sizes:
        key, kw, kb = jax.random.split(key, 3)
        bound = 1.0 / jnp.sqrt(jnp.float32(f_in))
        w = jax.random.uniform(kw, (f_in, f_out), jnp.float32, -bound, bound)
        b = jax.random.uniform(kb, (f_out,), jnp.float32, -bound, bound)
        params.append((w, b))
    return tuple(params)


if __name__ == "__main__":
    key = jax.random.PRNGKey(0)
    k_x, k_x2, k_p = jax.random.split(key, 3)
    params = init_params(k_p)

    # --- small batch, f32 operands (single-tile grid) ---
    BATCH = 8
    x = jax.random.normal(k_x, (BATCH, IN_SIZE), jnp.float32)
    prepared_f32 = prepare_params(params, jnp.float32)
    out = jax.block_until_ready(net_forward(x, prepared_f32))
    assert out.shape == (BATCH, OUT_SIZE)
    ref = ref_forward(x, params)
    assert jnp.allclose(out, ref, atol=1e-4, rtol=1e-4)

    # --- larger ragged batch (exercises the batch grid + resident weights) ---
    BATCH2 = 500
    x2 = jax.random.normal(k_x2, (BATCH2, IN_SIZE), jnp.float32)
    out2 = jax.block_until_ready(net_forward(x2, prepared_f32, block_b=128))
    ref2 = ref_forward(x2, params)
    assert out2.shape == (BATCH2, OUT_SIZE)
    assert jnp.allclose(out2, ref2, atol=1e-4, rtol=1e-4)

    # --- bf16 matmul operands (v6e/v7x fast path; f32 accumulate + epilogue) ---
    prepared_bf16 = prepare_params(params, jnp.bfloat16)
    out_bf16 = jax.block_until_ready(net_forward(x2, prepared_bf16, block_b=128))
    assert jnp.allclose(out_bf16, ref2, atol=3e-2, rtol=3e-2)

    print("KERNEL_OK")
</pallas_src>

<mosaic_0001>
module attributes {stable_mosaic.version = 11 : i64} {
  func.func @mlp_kernel(%arg0: i32, %arg1: memref<8x128xf32, #tpu.memory_space<vmem>>, %arg2: memref<128x128xf32, #tpu.memory_space<vmem>>, %arg3: memref<128x64xf32, #tpu.memory_space<vmem>>, %arg4: memref<64x32xf32, #tpu.memory_space<vmem>>, %arg5: memref<32x1xf32, #tpu.memory_space<vmem>>, %arg6: memref<4x128xf32, #tpu.memory_space<vmem>>, %arg7: memref<8x1xf32, #tpu.memory_space<vmem>>) attributes {dimension_semantics = [#tpu.dimension_semantics<parallel>], iteration_bounds = array<i64: 1>, scalar_prefetch = 0 : i64, scratch_operands = 0 : i64, tpu.core_type = #tpu.core_type<tc>, window_params = [{transform_indices = @transform_0, window_bounds = array<i64: 8, 128>}, {pipeline_mode = #tpu.pipeline_mode<synchronous>, transform_indices = @transform_1, window_bounds = array<i64: 128, 128>}, {pipeline_mode = #tpu.pipeline_mode<synchronous>, transform_indices = @transform_2, window_bounds = array<i64: 128, 64>}, {pipeline_mode = #tpu.pipeline_mode<synchronous>, transform_indices = @transform_3, window_bounds = array<i64: 64, 32>}, {pipeline_mode = #tpu.pipeline_mode<synchronous>, transform_indices = @transform_4, window_bounds = array<i64: 32, 1>}, {pipeline_mode = #tpu.pipeline_mode<synchronous>, transform_indices = @transform_5, window_bounds = array<i64: 4, 128>}, {transform_indices = @transform_6, window_bounds = array<i64: 8, 1>}]} {
    %c0 = arith.constant 0 : index
    %c0_0 = arith.constant 0 : index
    %0 = vector.load %arg6[%c0, %c0_0] : memref<4x128xf32, #tpu.memory_space<vmem>>, vector<4x128xf32>
    %1 = vector.extract_strided_slice %0 {offsets = [0, 0], sizes = [1, 128], strides = [1, 1]} : vector<4x128xf32> to vector<1x128xf32>
    %2 = vector.extract_strided_slice %0 {offsets = [1, 0], sizes = [1, 64], strides = [1, 1]} : vector<4x128xf32> to vector<1x64xf32>
    %3 = vector.extract_strided_slice %0 {offsets = [2, 0], sizes = [1, 32], strides = [1, 1]} : vector<4x128xf32> to vector<1x32xf32>
    %4 = vector.extract_strided_slice %0 {offsets = [3, 0], sizes = [1, 1], strides = [1, 1]} : vector<4x128xf32> to vector<1x1xf32>
    %c0_1 = arith.constant 0 : index
    %c0_2 = arith.constant 0 : index
    %5 = vector.load %arg1[%c0_1, %c0_2] : memref<8x128xf32, #tpu.memory_space<vmem>>, vector<8x128xf32>
    %c0_3 = arith.constant 0 : index
    %c0_4 = arith.constant 0 : index
    %6 = vector.load %arg2[%c0_3, %c0_4] : memref<128x128xf32, #tpu.memory_space<vmem>>, vector<128x128xf32>
    %cst = arith.constant dense<0.000000e+00> : vector<8x128xf32>
    %7 = tpu.matmul %5, %6, %cst {dimension_numbers = #tpu.dot_dimension_numbers<[1], [0], [0], [1], [0, 0, 1, 1], [], []>} : vector<8x128xf32>, vector<128x128xf32>, vector<8x128xf32> -> vector<8x128xf32>
    %8 = vector.broadcast %1 : vector<1x128xf32> to vector<8x128xf32>
    %9 = arith.addf %7, %8 : vector<8x128xf32>
    %cst_5 = arith.constant 0.000000e+00 : f32
    %10 = vector.broadcast %cst_5 : f32 to vector<8x128xf32>
    %11 = arith.maximumf %9, %10 : vector<8x128xf32>
    %c0_6 = arith.constant 0 : index
    %c0_7 = arith.constant 0 : index
    %12 = vector.load %arg3[%c0_6, %c0_7] : memref<128x64xf32, #tpu.memory_space<vmem>>, vector<128x64xf32>
    %cst_8 = arith.constant dense<0.000000e+00> : vector<8x64xf32>
    %13 = tpu.matmul %11, %12, %cst_8 {dimension_numbers = #tpu.dot_dimension_numbers<[1], [0], [0], [1], [0, 0, 1, 1], [], []>} : vector<8x128xf32>, vector<128x64xf32>, vector<8x64xf32> -> vector<8x64xf32>
    %14 = vector.broadcast %2 : vector<1x64xf32> to vector<8x64xf32>
    %15 = arith.addf %13, %14 : vector<8x64xf32>
    %cst_9 = arith.constant 0.000000e+00 : f32
    %16 = vector.broadcast %cst_9 : f32 to vector<8x64xf32>
    %17 = arith.maximumf %15, %16 : vector<8x64xf32>
    %c0_10 = arith.constant 0 : index
    %c0_11 = arith.constant 0 : index
    %18 = vector.load %arg4[%c0_10, %c0_11] : memref<64x32xf32, #tpu.memory_space<vmem>>, vector<64x32xf32>
    %cst_12 = arith.constant dense<0.000000e+00> : vector<8x32xf32>
    %19 = tpu.matmul %17, %18, %cst_12 {dimension_numbers = #tpu.dot_dimension_numbers<[1], [0], [0], [1], [0, 0, 1, 1], [], []>} : vector<8x64xf32>, vector<64x32xf32>, vector<8x32xf32> -> vector<8x32xf32>
    %20 = vector.broadcast %3 : vector<1x32xf32> to vector<8x32xf32>
    %21 = arith.addf %19, %20 : vector<8x32xf32>
    %cst_13 = arith.constant 0.000000e+00 : f32
    %22 = vector.broadcast %cst_13 : f32 to vector<8x32xf32>
    %23 = arith.maximumf %21, %22 : vector<8x32xf32>
    %c0_14 = arith.constant 0 : index
    %c0_15 = arith.constant 0 : index
    %24 = vector.load %arg5[%c0_14, %c0_15] : memref<32x1xf32, #tpu.memory_space<vmem>>, vector<32x1xf32>
    %cst_16 = arith.constant dense<0.000000e+00> : vector<8x1xf32>
    %25 = tpu.matmul %23, %24, %cst_16 {dimension_numbers = #tpu.dot_dimension_numbers<[1], [0], [0], [1], [0, 0, 1, 1], [], []>} : vector<8x32xf32>, vector<32x1xf32>, vector<8x1xf32> -> vector<8x1xf32>
    %26 = vector.broadcast %4 : vector<1x1xf32> to vector<8x1xf32>
    %27 = arith.addf %25, %26 : vector<8x1xf32>
    %c0_17 = arith.constant 0 : index
    %c0_18 = arith.constant 0 : index
    %28 = vector.load %arg7[%c0_17, %c0_18] : memref<8x1xf32, #tpu.memory_space<vmem>>, vector<8x1xf32>
    tpu.vector_store %arg7[%c0_17, %c0_18], %27 {strides = array<i32>} : memref<8x1xf32, #tpu.memory_space<vmem>>, vector<8x1xf32>,
    return
  }
  func.func @transform_0(%arg0: i32) -> (i32, i32) {
    %c0_i32 = arith.constant 0 : i32
    %c0_i32_0 = arith.constant 0 : i32
    return %arg0, %c0_i32 : i32, i32
  }
  func.func @transform_1(%arg0: i32) -> (i32, i32) {
    %c0_i32 = arith.constant 0 : i32
    %c0_i32_0 = arith.constant 0 : i32
    %c0_i32_1 = arith.constant 0 : i32
    return %c0_i32, %c0_i32_0 : i32, i32
  }
  func.func @transform_2(%arg0: i32) -> (i32, i32) {
    %c0_i32 = arith.constant 0 : i32
    %c0_i32_0 = arith.constant 0 : i32
    %c0_i32_1 = arith.constant 0 : i32
    return %c0_i32, %c0_i32_0 : i32, i32
  }
  func.func @transform_3(%arg0: i32) -> (i32, i32) {
    %c0_i32 = arith.constant 0 : i32
    %c0_i32_0 = arith.constant 0 : i32
    %c0_i32_1 = arith.constant 0 : i32
    return %c0_i32, %c0_i32_0 : i32, i32
  }
  func.func @transform_4(%arg0: i32) -> (i32, i32) {
    %c0_i32 = arith.constant 0 : i32
    %c0_i32_0 = arith.constant 0 : i32
    %c0_i32_1 = arith.constant 0 : i32
    return %c0_i32, %c0_i32_0 : i32, i32
  }
  func.func @transform_5(%arg0: i32) -> (i32, i32) {
    %c0_i32 = arith.constant 0 : i32
    %c0_i32_0 = arith.constant 0 : i32
    %c0_i32_1 = arith.constant 0 : i32
    return %c0_i32, %c0_i32_0 : i32, i32
  }
  func.func @transform_6(%arg0: i32) -> (i32, i32) {
    %c0_i32 = arith.constant 0 : i32
    %c0_i32_0 = arith.constant 0 : i32
    return %arg0, %c0_i32 : i32, i32
  }
}

</mosaic_0001>

<bundles_post_ra>
// kernel: tpu_custom_call.1
= control target key start
LH: loop header
LB: loop body
LE: loop exit
PB: predicated region body
PF: predicated region fallthrough
CT: control target
= control target key end

     0   :  { %vm110_vm0 = vcmask 523264   ;;  %vm140_vm1 = vcmask 261120   ;;  %vm164_vm2 = vcmask 7168   ;;  %s348_s1 = inlined_call_operand.vmem [shape: f32[128,128], index: 1, kind: input, shape index: {}]   ;;  %s349_s2 = inlined_call_operand.vmem [shape: f32[128,64], index: 2, kind: input, shape index: {}]   ;;  %s350_s0 = inlined_call_operand.vmem [shape: f32[8,128], index: 0, kind: input, shape index: {}]   ;;  %s351_s3 = inlined_call_operand.vmem [shape: f32[64,32], index: 3, kind: input, shape index: {}]   ;;  %s352_s5 = inlined_call_operand.vmem [shape: f32[4,128], index: 5, kind: input, shape index: {}]   ;;  %s353_s4 = inlined_call_operand.vmem [shape: f32[32,1], index: 4, kind: input, shape index: {}]   ;;  %s354_s6 = inlined_call_operand.vmem [shape: f32[8,1], index: 6, kind: output, shape index: {}]  }
   0x1   :  { %v40_v0 = vld [vmem:[%s348_s1 + $0x78] sm:$0xff]  ;;  %v39_v1 = vld [vmem:[%s348_s1 + $0x70] sm:$0xff]  ;;  %v38_v2 = vld [vmem:[%s348_s1 + $0x68] sm:$0xff] }
   0x2   :  { %42 = vmatpush.msra.mxu0 %v40_v0  ;;  %v37_v3 = vld [vmem:[%s348_s1 + $0x60] sm:$0xff]  ;;  %v78_v4 = vld [vmem:[%s349_s2 + $0x78] sm:$0xff]  ;;  %v77_v6 = vld [vmem:[%s349_s2 + $0x70] sm:$0xff] }
   0x3   :  { %v36_v5 = vld [vmem:[%s348_s1 + $0x58] sm:$0xff]  ;;  %80 = vmatpush.msra.mxu1 %v78_v4  ;;  %v76_v7 = vld [vmem:[%s349_s2 + $0x68] sm:$0xff]  ;;  %v35_v8 = vld [vmem:[%s348_s1 + $0x50] sm:$0xff] }
   0x4   :  { %43 = vmatpush.msra.mxu0 %v39_v1  ;;  %v75_v9 = vld [vmem:[%s349_s2 + $0x60] sm:$0xff]  ;;  %v34_v10 = vld [vmem:[%s348_s1 + $0x48] sm:$0xff]  ;;  %v74_v11 = vld [vmem:[%s349_s2 + $0x58] sm:$0xff] }
   0x5   :  { %81 = vmatpush.msra.mxu1 %v77_v6  ;;  %v33_v12 = vld [vmem:[%s348_s1 + $0x40] sm:$0xff]  ;;  %v73_v13 = vld [vmem:[%s349_s2 + $0x50] sm:$0xff]  ;;  %v32_v14 = vld [vmem:[%s348_s1 + $0x38] sm:$0xff] }
   0x6   :  { %44 = vmatpush.msra.mxu0 %v38_v2  ;;  %v72_v15 = vld [vmem:[%s349_s2 + $0x48] sm:$0xff]  ;;  %v31_v16 = vld [vmem:[%s348_s1 + $0x30] sm:$0xff]  ;;  %v71_v17 = vld [vmem:[%s349_s2 + $0x40] sm:$0xff] }
   0x7   :  { %82 = vmatpush.msra.mxu1 %v76_v7  ;;  %v30_v18 = vld [vmem:[%s348_s1 + $0x28] sm:$0xff]  ;;  %v70_v19 = vld [vmem:[%s349_s2 + $0x38] sm:$0xff]  ;;  %v29_v20 = vld [vmem:[%s348_s1 + $0x20] sm:$0xff] }
   0x8   :  { %45 = vmatpush.msra.mxu0 %v37_v3  ;;  %v69_v21 = vld [vmem:[%s349_s2 + $0x30] sm:$0xff]  ;;  %v28_v22 = vld [vmem:[%s348_s1 + $0x18] sm:$0xff]  ;;  %v68_v23 = vld [vmem:[%s349_s2 + $0x28] sm:$0xff] }
   0x9   :  { %83 = vmatpush.msra.mxu1 %v75_v9  ;;  %v27_v24 = vld [vmem:[%s348_s1 + $0x10] sm:$0xff]  ;;  %v67_v25 = vld [vmem:[%s349_s2 + $0x20] sm:$0xff]  ;;  %v26_v26 = vld [vmem:[%s348_s1 + $0x8] sm:$0xff] }
   0xa   :  { %46 = vmatpush.msra.mxu0 %v36_v5  ;;  %v66_v27 = vld [vmem:[%s349_s2 + $0x18] sm:$0xff]  ;;  %v25_v28 = vld [vmem:[%s348_s1] sm:$0xff]  ;;  %v65_v30 = vld [vmem:[%s349_s2 + $0x10] sm:$0xff] }
   0xb   :  { %84 = vmatpush.msra.mxu1 %v74_v11  ;;  %v24_v29 = vld [vmem:[%s350_s0] sm:$0xff]  ;;  %v64_v31 = vld [vmem:[%s349_s2 + $0x8] sm:$0xff]  ;;  %v108_v33 = vld [vmem:[%s351_s3 + $0x38] sm:$0xff] }
   0xc   :  { %47 = vmatpush.msra.mxu0 %v35_v8  ;;  %v63_v32 = vld [vmem:[%s349_s2] sm:$0xff]  ;;  %v107_v34 = vld [vmem:[%s351_s3 + $0x30] sm:$0xff]  ;;  %122 = vmatpush.msra.mxu2 %v108_v33  ;;  %v106_v35 = vld [vmem:[%s351_s3 + $0x28] sm:$0xff] }
   0xd   :  { %85 = vmatpush.msra.mxu1 %v73_v13  ;;  %v105_v36 = vld [vmem:[%s351_s3 + $0x20] sm:$0xff]  ;;  %v104_v37 = vld [vmem:[%s351_s3 + $0x18] sm:$0xff]  ;;  %v103_v43 = vld [vmem:[%s351_s3 + $0x10] sm:$0xff] }
   0xe   :  { %48 = vmatpush.msra.mxu0 %v34_v10  ;;  %123 = vmatpush.msra.mxu2 %v107_v34  ;;  %v23_v38 = vld [vmem:[%s352_s5] sm:$0xf]  ;;  %v102_v44 = vld [vmem:[%s351_s3 + $0x8] sm:$0xff]  ;;  %v138_v46 = vld [vmem:[%s353_s4 + $0x18] sm:$0xff] }
   0xf   :  { %86 = vmatpush.msra.mxu1 %v72_v15  ;;  %v41_v39 = vperm.slane %v23_v38, 0  ;;  %v101_v45 = vld [vmem:[%s351_s3] sm:$0xff]  ;;  %156 = vmatpush.msra.mxu3 %v138_v46  ;;  %v79_v47 = vperm.slane %v23_v38, 1  ;;  %v137_v51 = vld [vmem:[%s353_s4 + $0x10] sm:$0xff]  ;;  %v136_v52 = vld [vmem:[%s353_s4 + $0x8] sm:$0xff]  ;;  %v109_v54 = vperm.slane %v23_v38, 2 }
  0x10   :  { %49 = vmatpush.msra.mxu0 %v33_v12  ;;  %124 = vmatpush.msra.mxu2 %v106_v35  ;;  %v135_v53 = vld [vmem:[%s353_s4] sm:$0xff]  ;;  %v139_v58 = vperm.slane %v23_v38, 3 }
  0x11   :  { %87 = vmatpush.msra.mxu1 %v71_v17  ;;  %157 = vmatpush.msra.mxu3 %v137_v51 }
  0x12   :  { %50 = vmatpush.msra.mxu0 %v32_v14  ;;  %125 = vmatpush.msra.mxu2 %v105_v36 }
  0x13   :  { %88 = vmatpush.msra.mxu1 %v70_v19  ;;  %158 = vmatpush.msra.mxu3 %v136_v52 }
  0x14   :  { %51 = vmatpush.msra.mxu0 %v31_v16  ;;  %126 = vmatpush.msra.mxu2 %v104_v37 }
  0x15   :  { %89 = vmatpush.msra.mxu1 %v69_v21  ;;  %159 = vmatpush.msra.mxu3 %v135_v53 }
  0x16   :  { %52 = vmatpush.msra.mxu0 %v30_v18  ;;  %127 = vmatpush.msra.mxu2 %v103_v43 }
  0x17   :  { %90 = vmatpush.msra.mxu1 %v68_v23 }
  0x18   :  { %53 = vmatpush.msra.mxu0 %v29_v20  ;;  %128 = vmatpush.msra.mxu2 %v102_v44 }
  0x19   :  { %91 = vmatpush.msra.mxu1 %v67_v25 }
  0x1a   :  { %54 = vmatpush.msra.mxu0 %v28_v22  ;;  %129 = vmatpush.msra.mxu2 %v101_v45 }
  0x1b   :  { %92 = vmatpush.msra.mxu1 %v66_v27 }
  0x1c   :  { %55 = vmatpush.msra.mxu0 %v27_v24 }
  0x1d   :  { %93 = vmatpush.msra.mxu1 %v65_v30 }
  0x1e   :  { %56 = vmatpush.msra.mxu0 %v26_v26 }
  0x1f   :  { %94 = vmatpush.msra.mxu1 %v64_v31 }
  0x20   :  { %57 = vmatpush.msra.mxu0 %v25_v28 }
  0x21   :  { %58 = vmatmul.f32.vlgmr.msra.gmra.mxu0 %v24_v29  ;;  %95 = vmatpush.msra.mxu1 %v63_v32 }
  0x9e   :  { %v59_v40 = vpop.f32.mrf.mxu0 }
  0x9f   :  { %v60_v41 = vadd.f32 %v59_v40, %v41_v39 }
  0xa1   :  { %v62_v42 = vmax.f32 %v60_v41, 0.0 }
  0xa3   :  { %96 = vmatmul.f32.vlgmr.msra.gmra.mxu1 %v62_v42 }
 0x120   :  { %v97_v48 = vpop.f32.mrf.mxu1 }
 0x121   :  { %v98_v49 = vadd.f32 %v97_v48, %v79_v47 }
 0x123   :  { %v100_v50 = vmax.f32 %v98_v49, 0.0 }
 0x125   :  { %170 = vmatmul.msk.f32.vlgmr.msra.gmra.mxu2 %vm110_vm0, %v100_v50 }
 0x1a8   :  { %v131_v55 = vpop.f32.mrf.mxu2 }
 0x1a9   :  { %v132_v56 = vadd.f32 %v131_v55, %v109_v54 }
 0x1ab   :  { %v134_v57 = vmax.f32 %v132_v56, 0.0 }
 0x1ad   :  { %171 = vmatmul.msk.f32.vlgmr.msra.gmra.mxu3 %vm140_vm1, %v134_v57 }
 0x230   :  { %v161_v59 = vpop.f32.mrf.mxu3 }
 0x231   :  { %v162_v60 = vadd.f32 %v161_v59, %v139_v58 }
 0x233   :  { %165 = vst.msk [vmem:[%s354_s6] sm:$0xff] %vm164_vm2, %v162_v60 }

</bundles_post_ra>
